<compile_context>
chip_gen: v7x
topology: tpu7x:2x2x1
jax: 0.10.0
libtpu: 0.0.40
codegen_flags: <defaults>
</compile_context>

<pallas_src>
import math
import functools

import jax
import jax.numpy as jnp
from jax import lax
from jax.experimental import pallas as pl
from jax.experimental.pallas import tpu as pltpu


def _arc_adaptive_margin_kernel(labels_ref, mp_ref, x_ref, w_ref, out_ref, wn_ref, *,
                                s, easy_margin, smoothing, out_features, block_c):
    # Grid = (class tiles [outer], batch tiles [inner]).
    cls_tile = pl.program_id(0)
    batch_step = pl.program_id(1)

    # Refresh the normalized bf16 weight cache only when a new class tile arrives
    # (the weight block index is unchanged across batch steps, so both its DMA and
    # its normalization happen once per class tile).
    @pl.when(batch_step == 0)
    def _():
        w = w_ref[...].astype(jnp.float32)                       # (TC, D)
        eps = 1e-12
        inv = lax.rsqrt(jnp.maximum(jnp.sum(w * w, axis=-1, keepdims=True), eps * eps))
        wn_ref[...] = (w * inv).astype(jnp.bfloat16)

    xn = x_ref[...]            # (TB, D) bf16, L2-normalized in the wrapper
    labels = labels_ref[...]   # (TB, 1) int32
    mp = mp_ref[...]           # (TB, 4) f32 packed [cos_m, sin_m, th, mm]
    cos_m = mp[:, 0:1]
    sin_m = mp[:, 1:2]
    th = mp[:, 2:3]
    mm = mp[:, 3:4]

    # cosine = xn @ wn.T : contract the feature axis of both operands directly on
    # the MXU (no transpose materialization), bf16 inputs, f32 accumulation.
    cosine = lax.dot_general(
        xn, wn_ref[...],
        dimension_numbers=(((1,), (1,)), ((), ())),
        preferred_element_type=jnp.float32)                      # (TB, TC) f32

    # Global class ids of this tile's columns, compared against per-row labels.
    col_ids = lax.broadcasted_iota(jnp.int32, (1, cosine.shape[1]), 1) + cls_tile * block_c
    is_label = col_ids == labels                                 # (TB, TC) bool

    if smoothing > 0.0:
        # Dense path: smoothing mixes phi/cosine at every column.
        sine = jnp.sqrt(jnp.clip(1.0 - cosine * cosine, 0.0, 1.0))
        phi = cosine * cos_m - sine * sin_m
        if easy_margin:
            phi = jnp.where(cosine > 0.0, phi, cosine)
        else:
            phi = jnp.where(cosine > th, phi, cosine - mm)
        on_val = (1.0 - smoothing) + smoothing / out_features
        off_val = smoothing / out_features
        one_hot = jnp.where(is_label, on_val, off_val)
        out_ref[...] = ((cosine + one_hot * (phi - cosine)) * s).astype(out_ref.dtype)
    else:
        # Fast path: only the label column differs from s*cosine, so do the margin
        # math on that single (TB, 1) column.  If the label is not in this class
        # tile, is_label is all-False, cos_lab = 0, and the correction is 0.
        cos_lab = jnp.sum(jnp.where(is_label, cosine, 0.0), axis=-1, keepdims=True)
        sin_lab = jnp.sqrt(jnp.clip(1.0 - cos_lab * cos_lab, 0.0, 1.0))
        phi_lab = cos_lab * cos_m - sin_lab * sin_m
        if easy_margin:
            phi_lab = jnp.where(cos_lab > 0.0, phi_lab, cos_lab)
        else:
            phi_lab = jnp.where(cos_lab > th, phi_lab, cos_lab - mm)
        out_ref[...] = (s * cosine
                        + jnp.where(is_label, s * (phi_lab - cos_lab), 0.0)
                        ).astype(out_ref.dtype)


def arc_adaptive_margin_product(inputs, labels, weight, margins_table, *,
                                s=30.0, easy_margin=False, smoothing=0.0,
                                block_b=None, block_c=None, out_dtype=jnp.float32):
    """Pallas implementation of ArcAdaptiveMarginProduct.forward.

    inputs:        (B, in_features) float
    labels:        (B,) int class indices
    weight:        (out_features, in_features), any float dtype (streamed as-is)
    margins_table: (out_features,) float per-class adaptive margin (the dict
                   produced by _get_margins, densified).
    returns:       (B, out_features) out_dtype (default float32)
    """
    B, D = inputs.shape
    C, D2 = weight.shape
    assert D == D2
    labels = labels.astype(jnp.int32)

    # Per-sample margin parameters (mirrors the numpy/CPU prep in the torch forward):
    #   ms = margins[label]; cos_m, sin_m, th = cos(pi-ms), mm = sin(pi-ms)*ms
    ms = jnp.take(margins_table.astype(jnp.float32), labels)     # (B,)
    mparams = jnp.stack(
        [jnp.cos(ms), jnp.sin(ms), jnp.cos(jnp.pi - ms), jnp.sin(jnp.pi - ms) * ms],
        axis=1)                                                   # (B, 4) f32
    labels_2d = labels.reshape(B, 1)

    # F.normalize(x, eps=1e-12), hoisted out of the grid loop; bf16 for the MXU.
    eps = 1e-12
    xf = inputs.astype(jnp.float32)
    xn = (xf * lax.rsqrt(jnp.maximum(jnp.sum(xf * xf, axis=-1, keepdims=True),
                                     eps * eps))).astype(jnp.bfloat16)

    # Tile sizes: batch tile up to 256 rows (fills the 256-wide MXU on v6e/v7x,
    # doubles flops per weight byte), lane-dense class tiles up to 2048 columns
    # to amortize per-grid-step overhead while staying well inside VMEM.
    if block_b is None:
        block_b = min(B, 256)
    if block_c is None:
        block_c = C if C <= 2048 else 2048
    block_b = min(block_b, B)
    block_c = min(block_c, C)
    if block_c != C and block_c % 128 != 0:
        raise ValueError("block_c must equal out_features or be a multiple of 128")
    if block_b != B and block_b % 8 != 0:
        raise ValueError("block_b must equal the batch size or be a multiple of 8")

    # Class axis OUTER (weight tile stays resident / megacore-sharded on v7x),
    # batch axis INNER.
    grid = (pl.cdiv(C, block_c), pl.cdiv(B, block_b))

    # Derived VMEM budget (double-buffered tiles + scratch + f32 epilogue temps),
    # with 2x headroom, floored at the usual 32 MiB scoped default and capped
    # below v7x's 64 MiB physical VMEM.
    w_itemsize = jnp.dtype(weight.dtype).itemsize
    out_itemsize = jnp.dtype(out_dtype).itemsize
    footprint = (2 * block_c * D * w_itemsize        # weight tiles (native dtype)
                 + block_c * D * (2 + 4)             # bf16 wn cache + f32 temp
                 + 2 * block_b * D * 2               # bf16 xn tiles
                 + 2 * block_b * block_c * out_itemsize
                 + 2 * block_b * (4 + 1) * 4         # packed params + labels
                 + 6 * block_b * block_c * 4)        # f32 epilogue temporaries
    vmem_limit = int(min(max(2 * footprint, 32 * 1024 * 1024), 48 * 1024 * 1024))

    kernel = functools.partial(
        _arc_adaptive_margin_kernel,
        s=float(s), easy_margin=bool(easy_margin), smoothing=float(smoothing),
        out_features=C, block_c=block_c)

    batch_map = lambda j, i: (i, 0)                   # class-invariant operands
    return pl.pallas_call(
        kernel,
        out_shape=jax.ShapeDtypeStruct((B, C), out_dtype),
        grid=grid,
        in_specs=[
            pl.BlockSpec((block_b, 1), batch_map),             # labels (int32)
            pl.BlockSpec((block_b, 4), batch_map),             # packed margin params
            pl.BlockSpec((block_b, D), batch_map),             # normalized x (bf16)
            pl.BlockSpec((block_c, D), lambda j, i: (j, 0)),   # weight (resident per class tile)
        ],
        out_specs=pl.BlockSpec((block_b, block_c), lambda j, i: (i, j)),
        scratch_shapes=[pltpu.VMEM((block_c, D), jnp.bfloat16)],  # normalized-weight cache
        compiler_params=pltpu.CompilerParams(
            dimension_semantics=("parallel", "arbitrary"),
            vmem_limit_bytes=vmem_limit,
        ),
    )(labels_2d, mparams, xn, weight)


def _reference(x, lab, w, mtab, s, easy_margin, smoothing):
    """Pure-JAX rendering of the torch module's forward.  Uses the same
    normalization (rsqrt, eps=1e-12), the same bf16 matmul inputs with f32
    accumulation, and the same clipped sine as the kernel so the comparison
    tolerance can stay tight."""
    C = w.shape[0]
    ms = jnp.take(mtab.astype(jnp.float32), lab)
    cos_m = jnp.cos(ms)[:, None]
    sin_m = jnp.sin(ms)[:, None]
    th = jnp.cos(jnp.pi - ms)[:, None]
    mm = (jnp.sin(jnp.pi - ms) * ms)[:, None]
    eps = 1e-12
    xf = x.astype(jnp.float32)
    wf = w.astype(jnp.float32)
    xn = xf * lax.rsqrt(jnp.maximum(jnp.sum(xf * xf, -1, keepdims=True), eps * eps))
    wn = wf * lax.rsqrt(jnp.maximum(jnp.sum(wf * wf, -1, keepdims=True), eps * eps))
    cosine = jnp.dot(xn.astype(jnp.bfloat16), wn.astype(jnp.bfloat16).T,
                     preferred_element_type=jnp.float32)
    sine = jnp.sqrt(jnp.clip(1.0 - cosine * cosine, 0.0, 1.0))
    phi = cosine * cos_m - sine * sin_m
    if easy_margin:
        phi = jnp.where(cosine > 0.0, phi, cosine)
    else:
        phi = jnp.where(cosine > th, phi, cosine - mm)
    one_hot = jax.nn.one_hot(lab, C, dtype=jnp.float32)
    if smoothing > 0.0:
        one_hot = (1.0 - smoothing) * one_hot + smoothing / C
    return (one_hot * phi + (1.0 - one_hot) * cosine) * s


if __name__ == "__main__":
    # Small shapes consistent with the module; explicit tiles give a >1x>1 grid so
    # the class-outer / batch-inner residency path is exercised.
    B, in_features, out_features = 16, 32, 256

    key = jax.random.PRNGKey(0)
    k_x, k_w, k_l, k_m = jax.random.split(key, 4)

    # xavier_uniform_ on (out_features, in_features)
    bound = math.sqrt(6.0 / (in_features + out_features))
    weight = jax.random.uniform(k_w, (out_features, in_features), jnp.float32,
                                minval=-bound, maxval=bound)
    inputs = jax.random.normal(k_x, (B, in_features), jnp.float32)
    labels = jax.random.randint(k_l, (B,), 0, out_features, dtype=jnp.int32)
    # Per-class adaptive margins in [b, a+b] = [0.05, 0.5] (a=0.45, b=0.05 defaults).
    margins_table = jax.random.uniform(k_m, (out_features,), jnp.float32,
                                       minval=0.05, maxval=0.5)

    # Fast path (smoothing == 0), 2x2 grid of (8, 128) tiles.
    out = arc_adaptive_margin_product(inputs, labels, weight, margins_table,
                                      s=30.0, easy_margin=False, smoothing=0.0,
                                      block_b=8, block_c=128)
    out = jax.block_until_ready(out)
    expected = _reference(inputs, labels, weight, margins_table, 30.0, False, 0.0)
    assert out.shape == (B, out_features) and out.dtype == jnp.float32
    assert jnp.allclose(out, expected, atol=2e-3, rtol=2e-3)

    # Default tile sizes (single grid step).
    out_d = arc_adaptive_margin_product(inputs, labels, weight, margins_table,
                                        s=30.0, easy_margin=False, smoothing=0.0)
    out_d = jax.block_until_ready(out_d)
    assert jnp.allclose(out_d, expected, atol=2e-3, rtol=2e-3)

    # Dense path (smoothing > 0).
    out_s = arc_adaptive_margin_product(inputs, labels, weight, margins_table,
                                        s=30.0, easy_margin=False, smoothing=0.1,
                                        block_b=8, block_c=128)
    out_s = jax.block_until_ready(out_s)
    expected_s = _reference(inputs, labels, weight, margins_table, 30.0, False, 0.1)
    assert jnp.allclose(out_s, expected_s, atol=2e-3, rtol=2e-3)

    # Optional bf16 logits (halves the B*C output store).
    out_bf = arc_adaptive_margin_product(inputs, labels, weight, margins_table,
                                         s=30.0, easy_margin=False, smoothing=0.0,
                                         block_b=8, block_c=128,
                                         out_dtype=jnp.bfloat16)
    out_bf = jax.block_until_ready(out_bf)
    assert out_bf.dtype == jnp.bfloat16
    assert jnp.allclose(out_bf.astype(jnp.float32), expected, atol=0.3, rtol=2e-2)

    print("KERNEL_OK")
</pallas_src>

<mosaic_0001>
module attributes {stable_mosaic.version = 11 : i64} {
  func.func @_arc_adaptive_margin_kernel(%arg0: i32, %arg1: i32, %arg2: memref<8x1xi32, #tpu.memory_space<vmem>>, %arg3: memref<8x4xf32, #tpu.memory_space<vmem>>, %arg4: memref<8x32xbf16, #tpu.memory_space<vmem>>, %arg5: memref<128x32xf32, #tpu.memory_space<vmem>>, %arg6: memref<8x128xf32, #tpu.memory_space<vmem>>, %arg7: memref<128x32xbf16, #tpu.memory_space<vmem>>) attributes {dimension_semantics = [#tpu.dimension_semantics<parallel>, #tpu.dimension_semantics<arbitrary>], iteration_bounds = array<i64: 2, 2>, scalar_prefetch = 0 : i64, scratch_operands = 1 : i64, tpu.core_type = #tpu.core_type<tc>, window_params = [{transform_indices = @transform_0, window_bounds = array<i64: 8, 1>}, {transform_indices = @transform_1, window_bounds = array<i64: 8, 4>}, {transform_indices = @transform_2, window_bounds = array<i64: 8, 32>}, {transform_indices = @transform_3, window_bounds = array<i64: 128, 32>}, {transform_indices = @transform_4, window_bounds = array<i64: 8, 128>}]} {
    %c0_i32 = arith.constant 0 : i32
    %0 = arith.cmpi eq, %arg1, %c0_i32 : i32
    %1 = arith.extui %0 : i1 to i32
    %c0_i32_0 = arith.constant 0 : i32
    %2 = arith.cmpi ne, %1, %c0_i32_0 : i32
    scf.if %2 {
      %c0_18 = arith.constant 0 : index
      %c0_19 = arith.constant 0 : index
      %48 = vector.load %arg5[%c0_18, %c0_19] : memref<128x32xf32, #tpu.memory_space<vmem>>, vector<128x32xf32>
      %49 = arith.mulf %48, %48 : vector<128x32xf32>
      %cst_20 = arith.constant dense<0.000000e+00> : vector<128xf32>
      %50 = vector.multi_reduction <add>, %49, %cst_20 [1] : vector<128x32xf32> to vector<128xf32>
      %51 = vector.shape_cast %50 : vector<128xf32> to vector<128x1xf32>
      %cst_21 = arith.constant 1.000000e-24 : f32
      %52 = vector.broadcast %cst_21 : f32 to vector<128x1xf32>
      %53 = arith.maximumf %51, %52 : vector<128x1xf32>
      %54 = math.rsqrt %53 : vector<128x1xf32>
      %55 = vector.broadcast %54 : vector<128x1xf32> to vector<128x32xf32>
      %56 = arith.mulf %48, %55 : vector<128x32xf32>
      %57 = arith.truncf %56 : vector<128x32xf32> to vector<128x32xbf16>
      %c0_22 = arith.constant 0 : index
      %c0_23 = arith.constant 0 : index
      %58 = vector.load %arg7[%c0_22, %c0_23] : memref<128x32xbf16, #tpu.memory_space<vmem>>, vector<128x32xbf16>
      tpu.vector_store %arg7[%c0_22, %c0_23], %57 {strides = array<i32>} : memref<128x32xbf16, #tpu.memory_space<vmem>>, vector<128x32xbf16>,
    } else {
    }
    %c0 = arith.constant 0 : index
    %c0_1 = arith.constant 0 : index
    %3 = vector.load %arg4[%c0, %c0_1] : memref<8x32xbf16, #tpu.memory_space<vmem>>, vector<8x32xbf16>
    %c0_2 = arith.constant 0 : index
    %c0_3 = arith.constant 0 : index
    %4 = vector.load %arg2[%c0_2, %c0_3] : memref<8x1xi32, #tpu.memory_space<vmem>>, vector<8x1xi32>
    %c0_4 = arith.constant 0 : index
    %c0_5 = arith.constant 0 : index
    %5 = vector.load %arg3[%c0_4, %c0_5] : memref<8x4xf32, #tpu.memory_space<vmem>>, vector<8x4xf32>
    %6 = vector.extract_strided_slice %5 {offsets = [0, 0], sizes = [8, 1], strides = [1, 1]} : vector<8x4xf32> to vector<8x1xf32>
    %7 = vector.extract_strided_slice %5 {offsets = [0, 1], sizes = [8, 1], strides = [1, 1]} : vector<8x4xf32> to vector<8x1xf32>
    %8 = vector.extract_strided_slice %5 {offsets = [0, 2], sizes = [8, 1], strides = [1, 1]} : vector<8x4xf32> to vector<8x1xf32>
    %9 = vector.extract_strided_slice %5 {offsets = [0, 3], sizes = [8, 1], strides = [1, 1]} : vector<8x4xf32> to vector<8x1xf32>
    %c0_6 = arith.constant 0 : index
    %c0_7 = arith.constant 0 : index
    %10 = vector.load %arg7[%c0_6, %c0_7] : memref<128x32xbf16, #tpu.memory_space<vmem>>, vector<128x32xbf16>
    %cst = arith.constant dense<0.000000e+00> : vector<8x128xf32>
    %11 = tpu.matmul %3, %10, %cst {dimension_numbers = #tpu.dot_dimension_numbers<[1], [1], [0], [0], [0, 0, 1, 0], [], []>} : vector<8x32xbf16>, vector<128x32xbf16>, vector<8x128xf32> -> vector<8x128xf32>
    %12 = tpu.iota {dimensions = array<i32: 1>} : vector<1x128xi32>
    %c128_i32 = arith.constant 128 : i32
    %13 = arith.muli %arg0, %c128_i32 : i32
    %14 = vector.broadcast %13 : i32 to vector<1x128xi32>
    %15 = arith.addi %12, %14 : vector<1x128xi32>
    %16 = vector.broadcast %15 : vector<1x128xi32> to vector<8x128xi32>
    %17 = vector.broadcast %4 : vector<8x1xi32> to vector<8x128xi32>
    %18 = arith.cmpi eq, %16, %17 : vector<8x128xi32>
    %cst_8 = arith.constant 0.000000e+00 : f32
    %19 = vector.broadcast %cst_8 : f32 to vector<8x128xf32>
    %20 = arith.select %18, %11, %19 : vector<8x128xi1>, vector<8x128xf32>
    %cst_9 = arith.constant dense<0.000000e+00> : vector<8xf32>
    %21 = vector.multi_reduction <add>, %20, %cst_9 [1] : vector<8x128xf32> to vector<8xf32>
    %22 = vector.shape_cast %21 : vector<8xf32> to vector<8x1xf32>
    %23 = arith.mulf %22, %22 : vector<8x1xf32>
    %cst_10 = arith.constant 1.000000e+00 : f32
    %24 = vector.broadcast %cst_10 : f32 to vector<8x1xf32>
    %25 = arith.subf %24, %23 : vector<8x1xf32>
    %cst_11 = arith.constant 0.000000e+00 : f32
    %cst_12 = arith.constant 1.000000e+00 : f32
    %26 = vector.broadcast %cst_11 : f32 to vector<8x1xf32>
    %27 = arith.maximumf %26, %25 : vector<8x1xf32>
    %28 = vector.broadcast %cst_12 : f32 to vector<8x1xf32>
    %29 = arith.minimumf %28, %27 : vector<8x1xf32>
    %30 = math.sqrt %29 : vector<8x1xf32>
    %31 = arith.mulf %22, %6 : vector<8x1xf32>
    %32 = arith.mulf %30, %7 : vector<8x1xf32>
    %33 = arith.subf %31, %32 : vector<8x1xf32>
    %34 = arith.cmpf ogt, %22, %8 : vector<8x1xf32>
    %35 = arith.subf %22, %9 : vector<8x1xf32>
    %36 = arith.select %34, %33, %35 : vector<8x1xi1>, vector<8x1xf32>
    %cst_13 = arith.constant 3.000000e+01 : f32
    %37 = vector.broadcast %cst_13 : f32 to vector<8x128xf32>
    %38 = arith.mulf %37, %11 : vector<8x128xf32>
    %39 = arith.subf %36, %22 : vector<8x1xf32>
    %cst_14 = arith.constant 3.000000e+01 : f32
    %40 = vector.broadcast %cst_14 : f32 to vector<8x1xf32>
    %41 = arith.mulf %40, %39 : vector<8x1xf32>
    %cst_15 = arith.constant 0.000000e+00 : f32
    %42 = vector.shape_cast %41 : vector<8x1xf32> to vector<8x1xf32>
    %43 = vector.broadcast %42 : vector<8x1xf32> to vector<8x128xf32>
    %44 = vector.broadcast %cst_15 : f32 to vector<8x128xf32>
    %45 = arith.select %18, %43, %44 : vector<8x128xi1>, vector<8x128xf32>
    %46 = arith.addf %38, %45 : vector<8x128xf32>
    %c0_16 = arith.constant 0 : index
    %c0_17 = arith.constant 0 : index
    %47 = vector.load %arg6[%c0_16, %c0_17] : memref<8x128xf32, #tpu.memory_space<vmem>>, vector<8x128xf32>
    tpu.vector_store %arg6[%c0_16, %c0_17], %46 {strides = array<i32>} : memref<8x128xf32, #tpu.memory_space<vmem>>, vector<8x128xf32>,
    return
  }
  func.func @transform_0(%arg0: i32, %arg1: i32) -> (i32, i32) {
    %c0_i32 = arith.constant 0 : i32
    %c0_i32_0 = arith.constant 0 : i32
    return %arg1, %c0_i32 : i32, i32
  }
  func.func @transform_1(%arg0: i32, %arg1: i32) -> (i32, i32) {
    %c0_i32 = arith.constant 0 : i32
    %c0_i32_0 = arith.constant 0 : i32
    return %arg1, %c0_i32 : i32, i32
  }
  func.func @transform_2(%arg0: i32, %arg1: i32) -> (i32, i32) {
    %c0_i32 = arith.constant 0 : i32
    %c0_i32_0 = arith.constant 0 : i32
    return %arg1, %c0_i32 : i32, i32
  }
  func.func @transform_3(%arg0: i32, %arg1: i32) -> (i32, i32) {
    %c0_i32 = arith.constant 0 : i32
    %c0_i32_0 = arith.constant 0 : i32
    return %arg0, %c0_i32 : i32, i32
  }
  func.func @transform_4(%arg0: i32, %arg1: i32) -> (i32, i32) {
    %c0_i32 = arith.constant 0 : i32
    return %arg1, %arg0 : i32, i32
  }
}

</mosaic_0001>

<bundles_post_ra>
// kernel: tpu_custom_call.1
= control target key start
LH: loop header
LB: loop body
LE: loop exit
PB: predicated region body
PF: predicated region fallthrough
CT: control target
= control target key end

     0   :  { %9 = vsyncpa [#allocation4], 0  ;;  %s1258_s0 = inlined_call_operand.vmem [shape: s32[16,1], index: 0, kind: input, shape index: {}]   ;;  %s1259_s1 = inlined_call_operand.vmem [shape: f32[16,4], index: 1, kind: input, shape index: {}]   ;;  %s1260_s2 = inlined_call_operand.vmem [shape: bf16[16,32], index: 2, kind: input, shape index: {}]   ;;  %s1261_s3 = inlined_call_operand.vmem [shape: f32[256,32], index: 3, kind: input, shape index: {}]   ;;  %s1262_s4 = inlined_call_operand.hbm [shape: f32[16,256], index: 4, kind: output, shape index: {}]  }
   0x1   :  { %11 = vsyncpa [#allocation4 + $0x1], 0  ;;  %s958_s15 = smov 0   ;;  %s960_s16 = smov 0  }
   0x2   :  { %s962_s17 = smov 0   ;;  %s964_s18 = smov 0  }
   0x3   :  { %s966_s19 = smov 0   ;;  %s968_s20 = smov 0  }
   0x4   :  { %s970_s21 = smov 0   ;;  %s972_s22 = smov 0  }
   0x5 LB: > { %1268 = sst [smem:[#allocation6_spill]] %s916_s20  ;;  %s668_s23 = sadd.s32 4294967295, %s924_s22   ;;  %s924_s22 = sphi %s972_s22, %s17_s22   ;;  %s920_s21 = sphi %s970_s21, %s1280_s21   ;;  %s916_s20 = sphi %s968_s20, %s1279_s20   ;;  %s912_s19 = sphi %s966_s19, %s1278_s19   ;;  %s908_s18 = sphi %s964_s18, %s1277_s18   ;;  %s904_s17 = sphi %s962_s17, %s1283_s17   ;;  %s900_s16 = sphi %s960_s16, %s1282_s16   ;;  %s896_s15 = sphi %s958_s15, %s1281_s15  }
   0x6   : > { %1269 = sst [smem:[#allocation7_spill]] %s920_s21  ;;  %s669_s24 = sadd.s32 4294967294, %s924_s22  }
   0x7   : > { %s26_s25 = sadd.s32 1, %s916_s20  ;;  %s29_s26 = sadd.s32 1, %s920_s21 }
   0x8   : > { %p27_p0 = scmp.ge.s32.totalorder %s26_s25, 2  ;;  %p152_p1 = scmp.ne.s32.totalorder %s904_s17, %s900_s16 }
   0x9   : > { %p153_p2 = scmp.eq.s32.totalorder %s668_s23, 3  ;;  %p158_p5 = scmp.ne.s32.totalorder %s900_s16, %s896_s15 }
   0xa   : > { %s1285_s25 = smov (%p27_p0, %s26_s25), 0  ;;  %s1287_s26 = smov (!%p27_p0, %s29_s26), %s920_s21 }
   0xb   : > { %1270 = sst [smem:[#allocation8_spill]] %s1285_s25  ;;  %s137_s27 = ssub.s32 %s916_s20, %s1285_s25 }
   0xc   : > { %p1009_p3 = por %p153_p2, %p152_p1  ;;  %p31_p4 = scmp.ge.s32.totalorder %s1287_s26, 2 }
   0xd   : > { %p159_p6 = scmp.eq.s32.totalorder %s669_s24, 3  ;;  %p672_p7 = scmp.ge.s32.totalorder %s924_s22, 1 }
   0xe   : > { %s1289_s26 = smov (%p31_p4, %s1287_s26), 0  ;;  %p207_p9 = scmp.lt.s32.totalorder %s924_s22, 5 }
   0xf   : > { %1272 = sst [smem:[#allocation9_spill]] %s1289_s26  ;;  %p1018_p8 = por %p159_p6, %p158_p5 }
  0x10   : > { %s138_s30 = ssub.s32 %s920_s21, %s1289_s26  ;;  %s142_s5 = sadd.s32 1, %s904_s17 }
  0x11   : > { %s139_s6 = sor.u32 %s138_s30, %s137_s27  ;;  %p208_p10 = pnand %p672_p7, %p207_p9 }
  0x12   : > { %p140_p11 = scmp.eq.s32.totalorder %s139_s6, 0  ;;  %s1263_s8 = sand.u32 (!%p208_p10), 1, %s900_s16  }
  0x13   : > { %211 = sbr.rel (%p208_p10) target bundleno = 1056 (0x420), region = 36  ;;  %p245_p12 = scmp.lt.s32.totalorder (!%p208_p10), %s908_s18, 1 }
  0x14   : > { %s1027_s7 = scalar_select %p140_p11, %s904_s17, %s142_s5  }
  0x15   : > { %s1033_s9 = sshll.u32 (!%p208_p10), %s1263_s8, 3  ;;  %s677_s10 = sshll.u32 (!%p208_p10), %s912_s19, 4 }
  0x16   : > { %1274 = sst [smem:[#allocation10_spill]] %s1027_s7  ;;  %p258_p13 = scmp.lt.s32.totalorder (!%p208_p10), %s677_s10, 31 }
  0x17   : > { %s244_s7 = scalar_lea.vmem (!%p208_p10), [#allocation3], %s1033_s9  ;;  %p679_p0 = scmp.ne.s32.totalorder (!%p208_p10), %s908_s18, 0 }
  0x1a   : > { %s246_s11 = scalar_select %p245_p12, %s908_s18, 1 }
  0x1b   : > { %s1291_s10 = smov (!%p258_p13, %s677_s10), 31  ;;  %267 = sbr.rel (%p679_p0) target bundleno = 225 (0xe1), region = 40 }
  0x1c   : > { %s674_s12 = sshll.u32 %s246_s11, 3  ;;  %s676_s13 = sshll.u32 %s246_s11, 2  ;;  %vm300_vm0 = vcmask (!%p679_p0), 261120  }
  0x1d   : > { %s1040_s24 = scalar_lea.vmem %s1258_s0, %s674_s12  ;;  %s1045_s5 = scalar_lea.vmem %s1259_s1, %s674_s12 }
  0x1e   : > { %s1050_s26 = scalar_lea.vmem %s1260_s2, %s676_s13  ;;  %s678_s25 = sshll.u32 %s1291_s10, 3 }
  0x1f   : > { %s1055_s11 = scalar_lea.vmem %s1261_s3, %s678_s25 }
  0x20   : > { %v1060_v0 = vld [vmem:[%s1055_s11 + $0x10] sm:$0xff] (!%p679_p0)  ;;  %v1063_v1 = vld [vmem:[%s1055_s11] sm:$0xff] (!%p679_p0)  ;;  %v1066_v2 = vld [vmem:[%s1055_s11 + $0x18] sm:$0xff] (!%p679_p0) }
  0x21   : > { %v286_v3 = vmul.f32 (!%p679_p0), %v1060_v0, %v1060_v0  ;;  %v284_v4 = vmul.f32 (!%p679_p0), %v1063_v1, %v1063_v1  ;;  %v287_v5 = vmul.f32 (!%p679_p0), %v1066_v2, %v1066_v2  ;;  %v1075_v6 = vld [vmem:[%s1055_s11 + $0x8] sm:$0xff] (!%p679_p0)  ;;  %v1083_v9 = vld [vmem:[%s1055_s11 + $0x20] sm:$0xff] (!%p679_p0)  ;;  %v1094_v16 = vld [vmem:[%s1055_s11 + $0x38] sm:$0xff] (!%p679_p0) }
  0x22   : > { %v285_v7 = vmul.f32 %v1075_v6, %v1075_v6  ;;  %v1080_v8 = vld [vmem:[%s1055_s11 + $0x28] sm:$0xff]  ;;  %v288_v15 = vmul.f32 %v1083_v9, %v1083_v9  ;;  %v1097_v17 = vld [vmem:[%s1055_s11 + $0x30] sm:$0xff]  ;;  %v291_v20 = vmul.f32 %v1094_v16, %v1094_v16  ;;  %v1109_v23 = vld [vmem:[%s1055_s11 + $0x40] sm:$0xff] }
  0x23   : > { %v307_v10 = vsel %vm300_vm0, %v286_v3, 0.0  ;;  %v301_v11 = vsel %vm300_vm0, %v284_v4, 0.0  ;;  %v310_v12 = vsel %vm300_vm0, %v287_v5, 0.0  ;;  %v289_v14 = vmul.f32 %v1080_v8, %v1080_v8  ;;  %v1106_v22 = vld [vmem:[%s1055_s11 + $0x48] sm:$0xff]  ;;  %v1118_v28 = vld [vmem:[%s1055_s11 + $0x58] sm:$0xff]  ;;  %v1121_v29 = vld [vmem:[%s1055_s11 + $0x50] sm:$0xff] }
  0x24   : > { %308 = vadd.xlane.f32.xlu1 %v307_v10  ;;  %302 = vadd.xlane.f32.xlu0 %v301_v11  ;;  %v304_v13 = vsel %vm300_vm0, %v285_v7, 0.0  ;;  %v313_v19 = vsel %vm300_vm0, %v288_v15, 0.0  ;;  %v290_v21 = vmul.f32 %v1097_v17, %v1097_v17  ;;  %v322_v24 = vsel %vm300_vm0, %v291_v20, 0.0  ;;  %v1130_v34 = vld [vmem:[%s1055_s11 + $0x68] sm:$0xff]  ;;  %v1133_v35 = vld [vmem:[%s1055_s11 + $0x60] sm:$0xff]  ;;  %v1142_v40 = vld [vmem:[%s1055_s11 + $0x78] sm:$0xff] }
  0x25   : > { %v316_v18 = vsel %vm300_vm0, %v289_v14, 0.0  ;;  %v293_v26 = vmul.f32 %v1106_v22, %v1106_v22  ;;  %v292_v27 = vmul.f32 %v1109_v23, %v1109_v23  ;;  %v295_v32 = vmul.f32 %v1118_v28, %v1118_v28  ;;  %v1145_v41 = vld [vmem:[%s1055_s11 + $0x70] sm:$0xff] }
  0x26   : > { %v319_v25 = vsel %vm300_vm0, %v290_v21, 0.0  ;;  %v294_v33 = vmul.f32 %v1121_v29, %v1121_v29  ;;  %v297_v38 = vmul.f32 %v1130_v34, %v1130_v34  ;;  %v296_v39 = vmul.f32 %v1133_v35, %v1133_v35 }
  0x27   : > { %v328_v30 = vsel %vm300_vm0, %v293_v26, 0.0  ;;  %v325_v31 = vsel %vm300_vm0, %v292_v27, 0.0  ;;  %v334_v36 = vsel %vm300_vm0, %v295_v32, 0.0  ;;  %v299_v44 = vmul.f32 %v1142_v40, %v1142_v40 }
  0x28   : > { %311 = vadd.xlane.f32.xlu1 %v310_v12  ;;  %305 = vadd.xlane.f32.xlu0 %v304_v13  ;;  %v331_v37 = vsel %vm300_vm0, %v294_v33, 0.0  ;;  %v340_v42 = vsel %vm300_vm0, %v297_v38, 0.0  ;;  %v337_v43 = vsel %vm300_vm0, %v296_v39, 0.0  ;;  %v298_v45 = vmul.f32 %v1145_v41, %v1145_v41 }
  0x29   : > { %v346_v46 = vsel %vm300_vm0, %v299_v44, 0.0 }
  0x2a   : > { %v343_v47 = vsel %vm300_vm0, %v298_v45, 0.0 }
  0x2c   : > { %317 = vadd.xlane.f32.xlu1 %v316_v18  ;;  %314 = vadd.xlane.f32.xlu0 %v313_v19 }
  0x30   : > { %323 = vadd.xlane.f32.xlu1 %v322_v24  ;;  %320 = vadd.xlane.f32.xlu0 %v319_v25 }
  0x34   : > { %329 = vadd.xlane.f32.xlu1 %v328_v30  ;;  %326 = vadd.xlane.f32.xlu0 %v325_v31 }
  0x38   : > { %335 = vadd.xlane.f32.xlu1 %v334_v36  ;;  %332 = vadd.xlane.f32.xlu0 %v331_v37 }
  0x3c   : > { %341 = vadd.xlane.f32.xlu1 %v340_v42  ;;  %338 = vadd.xlane.f32.xlu0 %v337_v43 }
  0x40   : > { %347 = vadd.xlane.f32.xlu1 %v346_v46  ;;  %344 = vadd.xlane.f32.xlu0 %v343_v47 }
  0xb1   : > { %v309_v48 = vpop.xlane.xlu1 %308  ;;  %v303_v49 = vpop.xlane.xlu0 %302 }
  0xb2   : > { %v351_v50 = vmax.f32 %v309_v48, 1e-24  ;;  %v349_v51 = vmax.f32 %v303_v49, 1e-24 }
  0xb4   : > { %793 = vrsqrt.f32 %v351_v50 }
  0xb5   : > { %v312_v52 = vpop.xlane.xlu1 %311  ;;  %v306_v53 = vpop.xlane.xlu0 %305  ;;  %795 = vrsqrt.f32 %v349_v51 }
  0xb6   : > { %v352_v54 = vmax.f32 %v312_v52, 1e-24  ;;  %v350_v55 = vmax.f32 %v306_v53, 1e-24 }
  0xb8   : > { %797 = vrsqrt.f32 %v352_v54 }
  0xb9   : > { %799 = vrsqrt.f32 %v350_v55  ;;  %v318_v56 = vpop.xlane.xlu1 %317  ;;  %v315_v57 = vpop.xlane.xlu0 %314 }
  0xba   : > { %v354_v58 = vmax.f32 %v318_v56, 1e-24  ;;  %v353_v59 = vmax.f32 %v315_v57, 1e-24 }
  0xbc   : > { %801 = vrsqrt.f32 %v354_v58 }
  0xbd   : > { %803 = vrsqrt.f32 %v353_v59  ;;  %v324_v60 = vpop.xlane.xlu1 %323  ;;  %v321_v61 = vpop.xlane.xlu0 %320 }
  0xbe   : > { %v356_v62 = vmax.f32 %v324_v60, 1e-24  ;;  %v355_v63 = vmax.f32 %v321_v61, 1e-24  ;;  %v794_v3 = vpop.eup %793 }
  0xbf   : > { %v796_v4 = vpop.eup %795  ;;  %v383_v14 = vmul.f32 %v794_v3, %v1060_v0 }
  0xc0   : > { %805 = vrsqrt.f32 %v356_v62  ;;  %v381_v18 = vmul.f32 %v796_v4, %v1063_v1 }
  0xc1   : > { %807 = vrsqrt.f32 %v355_v63  ;;  %v330_v5 = vpop.xlane.xlu1 %329  ;;  %v327_v7 = vpop.xlane.xlu0 %326 }
  0xc2   : > { %v798_v10 = vpop.eup %797  ;;  %v358_v11 = vmax.f32 %v330_v5, 1e-24  ;;  %v357_v12 = vmax.f32 %v327_v7, 1e-24 }
  0xc3   : > { %v800_v13 = vpop.eup %799  ;;  %v384_v15 = vmul.f32 %v798_v10, %v1066_v2 }
  0xc4   : > { %v382_v19 = vmul.f32 %v800_v13, %v1075_v6  ;;  %809 = vrsqrt.f32 %v358_v11 }
  0xc5   : > { %v398_v20 = vpack.c.bf16 %v384_v15, %v383_v14  ;;  %811 = vrsqrt.f32 %v357_v12  ;;  %v336_v21 = vpop.xlane.xlu1 %335  ;;  %v333_v24 = vpop.xlane.xlu0 %332 }
  0xc6   : > { %v802_v25 = vpop.eup %801  ;;  %v397_v26 = vpack.c.bf16 %v382_v19, %v381_v18  ;;  %v360_v27 = vmax.f32 %v336_v21, 1e-24  ;;  %v359_v30 = vmax.f32 %v333_v24, 1e-24 }
  0xc7   : > { %v804_v31 = vpop.eup %803  ;;  %406 = vst.msk [vmem:[#allocation2 + $0x8] sm:$0xff] %vm300_vm0, %v398_v20  ;;  %v386_v0 = vmul.f32 %v802_v25, %v1080_v8 }
  0xc8   : > { %405 = vst.msk [vmem:[#allocation2] sm:$0xff] %vm300_vm0, %v397_v26  ;;  %v385_v1 = vmul.f32 %v804_v31, %v1083_v9  ;;  %813 = vrsqrt.f32 %v360_v27 }
  0xc9   : > { %815 = vrsqrt.f32 %v359_v30  ;;  %v342_v2 = vpop.xlane.xlu1 %341  ;;  %v339_v6 = vpop.xlane.xlu0 %338 }
  0xca   : > { %v806_v32 = vpop.eup %805  ;;  %v399_v33 = vpack.c.bf16 %v386_v0, %v385_v1  ;;  %v362_v36 = vmax.f32 %v342_v2, 1e-24  ;;  %v361_v37 = vmax.f32 %v339_v6, 1e-24 }
  0xcb   : > { %v808_v38 = vpop.eup %807  ;;  %v388_v39 = vmul.f32 %v806_v32, %v1094_v16 }
  0xcc   : > { %407 = vst.msk [vmem:[#allocation2 + $0x10] sm:$0xff] %vm300_vm0, %v399_v33  ;;  %v387_v42 = vmul.f32 %v808_v38, %v1097_v17  ;;  %817 = vrsqrt.f32 %v362_v36 }
  0xcd   : > { %819 = vrsqrt.f32 %v361_v37  ;;  %v348_v8 = vpop.xlane.xlu1 %347  ;;  %v345_v43 = vpop.xlane.xlu0 %344 }
  0xce   : > { %v810_v9 = vpop.eup %809  ;;  %v400_v44 = vpack.c.bf16 %v388_v39, %v387_v42  ;;  %v364_v45 = vmax.f32 %v348_v8, 1e-24  ;;  %v363_v46 = vmax.f32 %v345_v43, 1e-24 }
  0xcf   : > { %v812_v47 = vpop.eup %811  ;;  %v390_v48 = vmul.f32 %v810_v9, %v1106_v22 }
  0xd0   : > { %408 = vst.msk [vmem:[#allocation2 + $0x18] sm:$0xff] %vm300_vm0, %v400_v44  ;;  %v389_v49 = vmul.f32 %v812_v47, %v1109_v23  ;;  %821 = vrsqrt.f32 %v364_v45 }
  0xd1   : > { %823 = vrsqrt.f32 %v363_v46 }
  0xd2   : > { %v814_v16 = vpop.eup %813  ;;  %v401_v50 = vpack.c.bf16 %v390_v48, %v389_v49 }
  0xd3   : > { %v816_v17 = vpop.eup %815  ;;  %v392_v51 = vmul.f32 %v814_v16, %v1118_v28 }
  0xd4   : > { %409 = vst.msk [vmem:[#allocation2 + $0x20] sm:$0xff] %vm300_vm0, %v401_v50  ;;  %v391_v52 = vmul.f32 %v816_v17, %v1121_v29 }
  0xd6   : > { %v818_v53 = vpop.eup %817  ;;  %v402_v54 = vpack.c.bf16 %v392_v51, %v391_v52 }
  0xd7   : > { %v820_v55 = vpop.eup %819  ;;  %v394_v22 = vmul.f32 %v818_v53, %v1130_v34 }
  0xd8   : > { %410 = vst.msk [vmem:[#allocation2 + $0x28] sm:$0xff] %vm300_vm0, %v402_v54  ;;  %v393_v23 = vmul.f32 %v820_v55, %v1133_v35 }
  0xda   : > { %v822_v56 = vpop.eup %821  ;;  %v403_v57 = vpack.c.bf16 %v394_v22, %v393_v23 }
  0xdb   : > { %v824_v58 = vpop.eup %823  ;;  %v396_v59 = vmul.f32 %v822_v56, %v1142_v40 }
  0xdc   : > { %411 = vst.msk [vmem:[#allocation2 + $0x30] sm:$0xff] %vm300_vm0, %v403_v57  ;;  %v395_v28 = vmul.f32 %v824_v58, %v1145_v41 }
  0xde   : > { %v404_v60 = vpack.c.bf16 %v396_v59, %v395_v28 }
  0xe0   : > { %412 = vst.msk [vmem:[#allocation2 + $0x38] sm:$0xff] %vm300_vm0, %v404_v60 }
  0xe1 PF: > { %v416_v29 = vld [vmem:[#allocation2] sm:$0xff]  ;;  %vm424_vm1 = vcmask 261120   ;;  %v926_v34 = vmov 0.0   ;;  %vm927_vm2 = vmmov 0   ;;  %v928_v40 = vmov 0   ;;  %v417_v62 = vld [vmem:[#allocation2 + $0x8] sm:$0xff] }
  0xe2   : > { %696 = vmatprep.subr.bf16.mxu0 %v926_v34  ;;  %v429_v35 = vsel %vm424_vm1, %v416_v29, 0  ;;  %712 = vmatprep.mubr.msk.bf16.mxu0 %vm927_vm2, %v926_v34  ;;  %v414_v61 = vld [vmem:[%s1040_s24] sm:$0xff]  ;;  %v432_v41 = vsel %vm424_vm1, %v417_v62, 0  ;;  %v418_v63 = vld [vmem:[#allocation2 + $0x10] sm:$0xff]  ;;  %v419_v4 = vld [vmem:[#allocation2 + $0x18] sm:$0xff]  ;;  %v492_v20 = vlaneseq  ;;  %s681_s20 = sshll.u32 %s912_s19, 7 }
  0xe3   : > { %697 = vmatpush3.bf16.xpose.msra.mxu0 %v429_v35  ;;  %825 = vset.pattern.permute.xlu0 %v928_v40  ;;  %v435_v3 = vsel %vm424_vm1, %v418_v63, 0  ;;  %v438_v5 = vsel %vm424_vm1, %v419_v4, 0  ;;  %v420_v7 = vld [vmem:[#allocation2 + $0x20] sm:$0xff]  ;;  %v421_v11 = vld [vmem:[#allocation2 + $0x28] sm:$0xff]  ;;  %v422_v13 = vld [vmem:[#allocation2 + $0x30] sm:$0xff]  ;;  %v495_v24 = vstv %s681_s20  ;;  %s929_s21 = smov 127  }
  0xe4   : > { %698 = vmatprep.subr.bf16.mxu0 %v926_v34  ;;  %498 = vperm.xlu0 %825, %v414_v61   ;;  %v441_v10 = vsel %vm424_vm1, %v420_v7, 0  ;;  %v444_v12 = vsel %vm424_vm1, %v421_v11, 0  ;;  %v447_v14 = vsel %vm424_vm1, %v422_v13, 0  ;;  %v413_v19 = vld [vmem:[%s1050_s26] sm:$0xf]  ;;  %v493_v21 = vand.u32 127, %v492_v20 }
  0xe5   : > { %v415_v8 = vld [vmem:[%s1045_s5] sm:$0xff]  ;;  %v930_v44 = vmov 2   ;;  %s931_s25 = smov 2   ;;  %s683_s26 = sshll.u32 %s908_s18, 1 }
  0xe6   : > { %v496_v25 = vadd.s32 %v495_v24, %v493_v21  ;;  %826 = vset.pattern.permute.xlu1 %v930_v44  ;;  %s556_s8 = sadd.s32 %s912_s19, %s683_s26  ;;  %s560_s12 = sshll.u32 %s244_s7, 4  ;;  %s1203_s12 = int_to_ptr.vmem [resolvable:$true] %s560_s12 }
  0xe7   : > { %v423_v15 = vld [vmem:[#allocation2 + $0x38] sm:$0xff]  ;;  %s684_s10 = sshll.u32 %s556_s8, 7  ;;  %s1275_s18 = sand.u32 1, %s900_s16  }
  0xe8   : > { %v450_v18 = vsel %vm424_vm1, %v423_v15, 0  ;;  %827 = vset.pattern.permute.xlu0 %v930_v44  ;;  %s1201_s23 = scalar_lea.hbm %s1262_s4, %s684_s10  ;;  %s545_s19 = scalar_lea.sflag [#allocation4], %s1275_s18 }
  0xe9   : > { %s830_s24 = scalar_lea.vmem %s1203_s12, 128  ;;  %s932_s27 = smov [#allocation3]  }
  0xea   : > { %p831_p1 = scmp.ne.s32.totalorder %s1203_s12, %s830_s24  ;;  %s834_s30 = sshll.u32 %s932_s27, 4  ;;  %s835_s30 = int_to_ptr.vmem [resolvable:$false] %s834_s30 }
  0xeb   : > { %699 = vmatpush3.bf16.xpose.msra.mxu0 %v432_v41  ;;  %s836_s5 = scalar_lea.vmem %s835_s30, 256  ;;  %p837_p5 = scmp.lt.s32.totalorder %s1203_s12, %s835_s30 }
  0xec   : > { %700 = vmatprep.subr.bf16.mxu0 %v926_v34  ;;  %p832_p2 = pnand %p831_p1, %p1009_p3  ;;  %p838_p6 = scmp.lt.s32.totalorder %s836_s5, %s830_s24 }
  0xee   : > { %p833_p4 = pneg %p832_p2  ;;  %p839_p7 = por %p838_p6, %p837_p5 }
  0xf0   : > { %p840_p9 = pnand %p839_p7, %p833_p4 }
  0xf3   : > { %701 = vmatpush3.bf16.xpose.msra.mxu0 %v435_v3 }
  0xf4   : > { %702 = vmatprep.subr.bf16.mxu0 %v926_v34 }
  0xfb   : > { %703 = vmatpush3.bf16.xpose.msra.mxu0 %v438_v5 }
  0xfc   : > { %704 = vmatprep.subr.bf16.mxu0 %v926_v34 }
 0x103   : > { %705 = vmatpush3.bf16.xpose.msra.mxu0 %v441_v10 }
 0x104   : > { %706 = vmatprep.subr.bf16.mxu0 %v926_v34 }
 0x10b   : > { %707 = vmatpush3.bf16.xpose.msra.mxu0 %v444_v12 }
 0x10c   : > { %708 = vmatprep.subr.bf16.mxu0 %v926_v34 }
 0x113   : > { %709 = vmatpush3.bf16.xpose.msra.mxu0 %v447_v14 }
 0x114   : > { %710 = vmatprep.subr.bf16.mxu0 %v926_v34 }
 0x11b   : > { %711 = vmatpush3.bf16.xpose.msra.mxu0 %v450_v18 }
 0x122   : > { %713 = vmatmul.mubr.msk.bf16.vlgmr.msra.gmra.mrb[0].mxu0 %vm424_vm1, %v413_v19 }
 0x163   : > { %v499_v26 = vpop.permute.xlu0 %498 }
 0x164   : > { %vm500_vm3 = vcmp.eq.s32.totalorder %v496_v25, %v499_v26 }
 0x1f5   : > { %v486_v27 = vpop.f32.mrb[0].mxu0 }
 0x1f6   : > { %v714_v30 = vpop.f32.mrb[1].mxu0  ;;  %v501_v31 = vsel %vm500_vm3, %v486_v27, 0.0  ;;  %v533_v52 = vmul.f32 30.0, %v486_v27 }
 0x1f7   : > { %502 = vadd.xlane.f32.xlu0 %v501_v31  ;;  %v489_v0 = vpop.f32.mrb[2].mxu0 }
 0x1f8   : > { %v715_v1 = vpop.f32.mrb[3].mxu0 }
 0x284   : > { %v503_v2 = vpop.xlane.xlu0 %502 }
 0x285   : > { %v504_v6 = vmul.f32 %v503_v2, %v503_v2  ;;  %v515_v45 = vmul.f32 %v503_v2, %v415_v8  ;;  %v523_v48 = vsub.f32 %v503_v2, %v415_v8  ;;  %vm522_vm6 = vcmp.gt.f32.partialorder %v503_v2, %v415_v8 }
 0x287   : > { %v505_v32 = vsub.f32 1.0, %v504_v6 }
 0x289   : > { %v506_v33 = vmax.f32 %v505_v32, 0.0 }
 0x28b   : > { %v507_v36 = vmin.f32 %v506_v33, 1.0 }
 0x28d   : > { %828 = vrsqrt.f32 %v507_v36  ;;  %vm510_vm4 = vcmp.eq.f32.partialorder %v507_v36, inf  ;;  %v513_v39 = vand.u32 2147483648, %v507_v36  ;;  %vm512_vm5 = vcmp.eq.f32.partialorder %v507_v36, 0.0 }
 0x297   : > { %v829_v37 = vpop.eup %828 }
 0x298   : > { %v509_v38 = vmul.f32 %v829_v37, %v507_v36 }
 0x29a   : > { %v511_v42 = vsel %vm510_vm4, %v507_v36, %v509_v38 }
 0x29b   : > { %v514_v43 = vsel %vm512_vm5, %v513_v39, %v511_v42 }
 0x29c   : > { %v516_v9 = vmul.f32 %v514_v43, %v415_v8 }
 0x29e   : > { %518 = vrot.lane.b32.xlu1 %v516_v9, %s929_s21 }
 0x310   : > { %v519_v46 = vpop.permute.xlu1 %518 }
 0x311   : > { %v521_v47 = vsub.f32 %v515_v45, %v519_v46 }
 0x313   : > { %525 = vrot.lane.b32.xlu1 %v521_v47, %s931_s25 }
 0x317   : > { %529 = vrot.lane.b32.xlu1 %v523_v48, %s929_s21 }
 0x385   : > { %v526_v49 = vpop.permute.xlu1 %525 }
 0x389   : > { %v530_v16 = vpop.permute.xlu1 %529 }
 0x38a   : > { %v532_v50 = vsel %vm522_vm6, %v526_v49, %v530_v16 }
 0x38b   : > { %v534_v17 = vsub.f32 %v532_v50, %v503_v2 }
 0x38d   : > { %v535_v51 = vmul.f32 30.0, %v534_v17 }
 0x38f   : > { %538 = vperm.xlu1 %826, %v535_v51  }
 0x40e   : > { %v539_v53 = vpop.permute.xlu1 %538 }
 0x40f   : > { %v541_v54 = vsel %vm500_vm3, %v539_v53, 0.0 }
 0x410   : > { %v542_v55 = vadd.f32 %v541_v54, %v533_v52 }
 0x412   : > { %543 = vst [vmem:[%s244_s7] sm:$0xff] %v542_v55 }
 0x413   : > { %843 = shalt.err (!%p840_p9)
}
 0x414   : > { %s844_s7 = scalar_lea.hbm %s1201_s23, 128  ;;  %s848_s11 = scalar_lea.hbm %s1262_s4, 512 }
 0x415   : > { %p845_p10 = scmp.ne.s32.totalorder %s1201_s23, %s844_s7  ;;  %p849_p13 = scmp.lt.u32.totalorder %s1201_s23, %s1262_s4 }
 0x416   : > { %p850_p0 = scmp.lt.u32.totalorder %s848_s11, %s844_s7  ;;  %p852_p2 = scmp.lt.u32.totalorder %s844_s7, %s1201_s23 }
 0x417   : > { %p846_p11 = pnand %p845_p10, %p1009_p3 }
 0x418   : > { %p851_p1 = por %p850_p0, %p849_p13 }
 0x419   : > { %p847_p12 = pneg %p846_p11 }
 0x41a   : > { %p853_p4 = por %p852_p2, %p851_p1 }
 0x41c   : > { %p854_p5 = pnand %p853_p4, %p847_p12 }
 0x41e   : > { %857 = shalt.err (!%p854_p5)
}
 0x41f   : > { %716 = dma.vmem_to_hbm [thread:$0]  (%p1009_p3), %s1203_s12, 128, %s1201_s23, %s545_s19  }
 0x420 PF: > { %p722_p6 = scmp.ge.s32.totalorder %s924_s22, 2  ;;  %s572_s25 = sand.u32 1, %s896_s15  }
 0x421   : > { %s573_s26 = scalar_lea.sflag [#allocation4], %s572_s25 }
 0x422   : > { %p719_p7 = pnand %p722_p6, %p1018_p8 }
 0x424   : > { %891 = dma.done.wait (!%p719_p7), %s573_s26, 128  }
 0x425   : > { %893 = vsyncadd (!%p719_p7), %s573_s26, 4294967168  ;;  %s17_s22 = sadd.s32 1, %s924_s22   ;;  %s1276_s28 = sld [smem:[#allocation10_spill]] }
 0x426   : > { %p14_p9 = scmp.ge.s32.totalorder %s17_s22, 6   ;;  %s1277_s18 = sld [smem:[#allocation6_spill]] }
 0x427   : > { %s1278_s19 = sld [smem:[#allocation7_spill]]  ;;  %s1279_s20 = sld [smem:[#allocation8_spill]] }
 0x428   : > { %s1280_s21 = sld [smem:[#allocation9_spill]]  ;;  %s1281_s15 = smov %s900_s16 }
 0x429   : > { %s1282_s16 = smov %s904_s17  ;;  %16 = sbr.rel (!%p14_p9) target bundleno = 5 (0x5), region = 84 }
 0x42b   : > { %s1283_s17 = smov %s1276_s28 }
 0x430   :  { %578 = vsyncpa [#allocation4], 1 }
 0x431   :  { %580 = vsyncpa [#allocation4 + $0x1], 1 }

</bundles_post_ra>
